<compile_context>
chip_gen: v6e
topology: v6e:2x2x1
jax: 0.10.0
libtpu: 0.0.40
codegen_flags: <defaults>
</compile_context>

<pallas_src>
import functools

import jax
import jax.numpy as jnp
from jax.experimental import pallas as pl
from jax.experimental.pallas import tpu as pltpu

BN_EPS = 1e-5


def _round_up(x, m):
    return ((x + m - 1) // m) * m


# ---------------------------------------------------------------------------
# Pallas kernels
# ---------------------------------------------------------------------------
def _linear_kernel(x_ref, w_ref, b_ref, o_ref):
    """Single Linear: out = x @ W + b  (num_passive == 1 branch)."""
    acc = jnp.dot(x_ref[...], w_ref[...], preferred_element_type=jnp.float32)
    o_ref[...] = (acc + b_ref[...]).astype(o_ref.dtype)


def _mlp_head_kernel(x_ref, w1_ref, b1_ref, w2_ref, b2_ref, o_ref):
    """Fused Linear(+folded eval-BN) -> [Dropout=id in eval] -> Linear.

    The intermediate activation (tile_m x hidden) never leaves VMEM.
    """
    h = jnp.dot(x_ref[...], w1_ref[...], preferred_element_type=jnp.float32)
    h = h + b1_ref[...]          # conv/BN already folded into w1/b1 in wrapper
    # Dropout: identity in eval mode.
    acc = jnp.dot(h, w2_ref[...], preferred_element_type=jnp.float32)
    o_ref[...] = (acc + b2_ref[...]).astype(o_ref.dtype)


# ---------------------------------------------------------------------------
# Wrapper: one pallas_call, batch tiled along M, "parallel" semantics
# ---------------------------------------------------------------------------
def _run_tiled(kernel, x, mats_and_biases, out_cols, *, tile_m=128):
    """Run `kernel` over x tiled along the batch (M) dimension."""
    B, K = x.shape
    tm = min(tile_m, _round_up(B, 8))
    Bp = _round_up(B, tm)
    if Bp != B:
        x = jnp.pad(x, ((0, Bp - B), (0, 0)))

    in_specs = [pl.BlockSpec((tm, K), lambda i: (i, 0))]
    for a in mats_and_biases:
        r, c = a.shape
        in_specs.append(pl.BlockSpec((r, c), lambda i: (0, 0)))

    out = pl.pallas_call(
        kernel,
        out_shape=jax.ShapeDtypeStruct((Bp, out_cols), jnp.float32),
        grid_spec=pltpu.PrefetchScalarGridSpec(
            num_scalar_prefetch=0,
            grid=(Bp // tm,),
            in_specs=in_specs,
            out_specs=pl.BlockSpec((tm, out_cols), lambda i: (i, 0)),
        ),
        compiler_params=pltpu.CompilerParams(
            dimension_semantics=("parallel",)),
    )(x, *mats_and_biases)
    return out[:B]


def deepfm_active_forward(x, params, num_passive):
    """Pallas implementation of DeepFM_active.forward (eval semantics)."""
    if num_passive == 1:
        w, b = params["w"], params["b"]
        return _run_tiled(_linear_kernel, x, (w, b.reshape(1, -1)), w.shape[1])

    if num_passive == 3:
        w1, b1 = params["w1"], params["b1"]
        w2, b2 = params["w2"], params["b2"]
        gamma, beta, mean, var = (params["gamma"], params["beta"],
                                  params["mean"], params["var"])
        # Fold eval-mode BatchNorm1d into Linear1 (exact):
        #   BN(xW1 + b1) = (xW1 + b1 - mean) * s + beta,  s = gamma/sqrt(var+eps)
        #               = x (W1 * s) + ((b1 - mean) * s + beta)
        scale = gamma / jnp.sqrt(var + BN_EPS)
        w1_eff = w1 * scale[None, :]
        b1_eff = (b1 - mean) * scale + beta
        return _run_tiled(
            _mlp_head_kernel, x,
            (w1_eff, b1_eff.reshape(1, -1), w2, b2.reshape(1, -1)),
            w2.shape[1])

    raise ValueError("The number of passive parties must be 1 or 3.")


# ---------------------------------------------------------------------------
# Deterministic parameter initialization (shapes from the module __init__)
# ---------------------------------------------------------------------------
def init_params(key, hidden_size, num_classes, num_passive):
    if num_passive == 1:
        k1, k2 = jax.random.split(key)
        w = jax.random.normal(k1, (hidden_size, num_classes), jnp.float32)
        w = w / jnp.sqrt(float(hidden_size))
        b = 0.1 * jax.random.normal(k2, (num_classes,), jnp.float32)
        return {"w": w, "b": b}

    ks = jax.random.split(key, 8)
    in_dim = hidden_size * 3
    w1 = jax.random.normal(ks[0], (in_dim, hidden_size), jnp.float32)
    w1 = w1 / jnp.sqrt(float(in_dim))
    b1 = 0.1 * jax.random.normal(ks[1], (hidden_size,), jnp.float32)
    gamma = 1.0 + 0.1 * jax.random.normal(ks[2], (hidden_size,), jnp.float32)
    beta = 0.1 * jax.random.normal(ks[3], (hidden_size,), jnp.float32)
    mean = 0.1 * jax.random.normal(ks[4], (hidden_size,), jnp.float32)
    var = jax.random.uniform(ks[5], (hidden_size,), jnp.float32, 0.5, 1.5)
    w2 = jax.random.normal(ks[6], (hidden_size, num_classes), jnp.float32)
    w2 = w2 / jnp.sqrt(float(hidden_size))
    b2 = 0.1 * jax.random.normal(ks[7], (num_classes,), jnp.float32)
    return {"w1": w1, "b1": b1, "gamma": gamma, "beta": beta,
            "mean": mean, "var": var, "w2": w2, "b2": b2}


# ---------------------------------------------------------------------------
# Pure-JAX reference (for correctness check; eval-mode semantics)
# ---------------------------------------------------------------------------
def reference_forward(x, params, num_passive):
    if num_passive == 1:
        return jnp.dot(x, params["w"]) + params["b"]
    h = jnp.dot(x, params["w1"]) + params["b1"]
    scale = params["gamma"] / jnp.sqrt(params["var"] + BN_EPS)
    h = (h - params["mean"]) * scale + params["beta"]
    # Dropout eval-mode = identity.
    return jnp.dot(h, params["w2"]) + params["b2"]


if __name__ == "__main__":
    key = jax.random.PRNGKey(0)
    kx1, kx3, kp1, kp3 = jax.random.split(key, 4)

    hidden_size = 32
    num_classes = 10
    batch = 8
    dropout = 0.5  # unused in eval-mode forward

    # --- num_passive == 3 branch: Linear -> BN1d -> Dropout -> Linear ------
    x3 = jax.random.normal(kx3, (batch, hidden_size * 3), jnp.float32)
    params3 = init_params(kp3, hidden_size, num_classes, num_passive=3)
    out3 = jax.block_until_ready(deepfm_active_forward(x3, params3, 3))
    assert out3.shape == (batch, num_classes), out3.shape
    ref3 = reference_forward(x3, params3, 3)
    err3 = float(jnp.max(jnp.abs(out3 - ref3)))
    assert jnp.allclose(out3, ref3, atol=1e-3, rtol=1e-3), f"max abs err {err3}"

    # --- num_passive == 1 branch: single Linear -----------------------------
    x1 = jax.random.normal(kx1, (batch, hidden_size), jnp.float32)
    params1 = init_params(kp1, hidden_size, num_classes, num_passive=1)
    out1 = jax.block_until_ready(deepfm_active_forward(x1, params1, 1))
    assert out1.shape == (batch, num_classes), out1.shape
    ref1 = reference_forward(x1, params1, 1)
    err1 = float(jnp.max(jnp.abs(out1 - ref1)))
    assert jnp.allclose(out1, ref1, atol=1e-3, rtol=1e-3), f"max abs err {err1}"

    print("KERNEL_OK")
</pallas_src>

<mosaic_0001>
module attributes {stable_mosaic.version = 11 : i64} {
  func.func @_mlp_head_kernel(%arg0: i32, %arg1: memref<8x96xf32, #tpu.memory_space<vmem>>, %arg2: memref<96x32xf32, #tpu.memory_space<vmem>>, %arg3: memref<1x32xf32, #tpu.memory_space<vmem>>, %arg4: memref<32x10xf32, #tpu.memory_space<vmem>>, %arg5: memref<1x10xf32, #tpu.memory_space<vmem>>, %arg6: memref<8x10xf32, #tpu.memory_space<vmem>>) attributes {dimension_semantics = [#tpu.dimension_semantics<parallel>], iteration_bounds = array<i64: 1>, scalar_prefetch = 0 : i64, scratch_operands = 0 : i64, tpu.core_type = #tpu.core_type<tc>, window_params = [{transform_indices = @transform_0, window_bounds = array<i64: 8, 96>}, {pipeline_mode = #tpu.pipeline_mode<synchronous>, transform_indices = @transform_1, window_bounds = array<i64: 96, 32>}, {pipeline_mode = #tpu.pipeline_mode<synchronous>, transform_indices = @transform_2, window_bounds = array<i64: 1, 32>}, {pipeline_mode = #tpu.pipeline_mode<synchronous>, transform_indices = @transform_3, window_bounds = array<i64: 32, 10>}, {pipeline_mode = #tpu.pipeline_mode<synchronous>, transform_indices = @transform_4, window_bounds = array<i64: 1, 10>}, {transform_indices = @transform_5, window_bounds = array<i64: 8, 10>}]} {
    %c0 = arith.constant 0 : index
    %c0_0 = arith.constant 0 : index
    %0 = vector.load %arg1[%c0, %c0_0] : memref<8x96xf32, #tpu.memory_space<vmem>>, vector<8x96xf32>
    %c0_1 = arith.constant 0 : index
    %c0_2 = arith.constant 0 : index
    %1 = vector.load %arg2[%c0_1, %c0_2] : memref<96x32xf32, #tpu.memory_space<vmem>>, vector<96x32xf32>
    %cst = arith.constant dense<0.000000e+00> : vector<8x32xf32>
    %2 = tpu.matmul %0, %1, %cst {dimension_numbers = #tpu.dot_dimension_numbers<[1], [0], [0], [1], [0, 0, 1, 1], [], []>} : vector<8x96xf32>, vector<96x32xf32>, vector<8x32xf32> -> vector<8x32xf32>
    %c0_3 = arith.constant 0 : index
    %c0_4 = arith.constant 0 : index
    %3 = vector.load %arg3[%c0_3, %c0_4] : memref<1x32xf32, #tpu.memory_space<vmem>>, vector<1x32xf32>
    %4 = vector.broadcast %3 : vector<1x32xf32> to vector<8x32xf32>
    %5 = arith.addf %2, %4 : vector<8x32xf32>
    %c0_5 = arith.constant 0 : index
    %c0_6 = arith.constant 0 : index
    %6 = vector.load %arg4[%c0_5, %c0_6] : memref<32x10xf32, #tpu.memory_space<vmem>>, vector<32x10xf32>
    %cst_7 = arith.constant dense<0.000000e+00> : vector<8x10xf32>
    %7 = tpu.matmul %5, %6, %cst_7 {dimension_numbers = #tpu.dot_dimension_numbers<[1], [0], [0], [1], [0, 0, 1, 1], [], []>} : vector<8x32xf32>, vector<32x10xf32>, vector<8x10xf32> -> vector<8x10xf32>
    %c0_8 = arith.constant 0 : index
    %c0_9 = arith.constant 0 : index
    %8 = vector.load %arg5[%c0_8, %c0_9] : memref<1x10xf32, #tpu.memory_space<vmem>>, vector<1x10xf32>
    %9 = vector.broadcast %8 : vector<1x10xf32> to vector<8x10xf32>
    %10 = arith.addf %7, %9 : vector<8x10xf32>
    %c0_10 = arith.constant 0 : index
    %c0_11 = arith.constant 0 : index
    %11 = vector.load %arg6[%c0_10, %c0_11] : memref<8x10xf32, #tpu.memory_space<vmem>>, vector<8x10xf32>
    tpu.vector_store %arg6[%c0_10, %c0_11], %10 {strides = array<i32>} : memref<8x10xf32, #tpu.memory_space<vmem>>, vector<8x10xf32>,
    return
  }
  func.func @transform_0(%arg0: i32) -> (i32, i32) {
    %c0_i32 = arith.constant 0 : i32
    %c0_i32_0 = arith.constant 0 : i32
    return %arg0, %c0_i32 : i32, i32
  }
  func.func @transform_1(%arg0: i32) -> (i32, i32) {
    %c0_i32 = arith.constant 0 : i32
    %c0_i32_0 = arith.constant 0 : i32
    %c0_i32_1 = arith.constant 0 : i32
    return %c0_i32, %c0_i32_0 : i32, i32
  }
  func.func @transform_2(%arg0: i32) -> (i32, i32) {
    %c0_i32 = arith.constant 0 : i32
    %c0_i32_0 = arith.constant 0 : i32
    %c0_i32_1 = arith.constant 0 : i32
    return %c0_i32, %c0_i32_0 : i32, i32
  }
  func.func @transform_3(%arg0: i32) -> (i32, i32) {
    %c0_i32 = arith.constant 0 : i32
    %c0_i32_0 = arith.constant 0 : i32
    %c0_i32_1 = arith.constant 0 : i32
    return %c0_i32, %c0_i32_0 : i32, i32
  }
  func.func @transform_4(%arg0: i32) -> (i32, i32) {
    %c0_i32 = arith.constant 0 : i32
    %c0_i32_0 = arith.constant 0 : i32
    %c0_i32_1 = arith.constant 0 : i32
    return %c0_i32, %c0_i32_0 : i32, i32
  }
  func.func @transform_5(%arg0: i32) -> (i32, i32) {
    %c0_i32 = arith.constant 0 : i32
    %c0_i32_0 = arith.constant 0 : i32
    return %arg0, %c0_i32 : i32, i32
  }
}

</mosaic_0001>

<bundles_post_ra>
// kernel: tpu_custom_call.1
= control target key start
LH: loop header
LB: loop body
LE: loop exit
PB: predicated region body
PF: predicated region fallthrough
CT: control target
= control target key end

     0   :  { %v301_v1 = vmov 0.0   ;;  %vm302_vm0 = vmmov 0   ;;  %s394_s0 = inlined_call_operand.vmem [shape: f32[8,96], index: 0, kind: input, shape index: {}]   ;;  %s395_s1 = inlined_call_operand.vmem [shape: f32[96,32], index: 1, kind: input, shape index: {}]   ;;  %s396_s2 = inlined_call_operand.vmem [shape: f32[1,32], index: 2, kind: input, shape index: {}]   ;;  %s397_s3 = inlined_call_operand.vmem [shape: f32[32,10], index: 3, kind: input, shape index: {}]   ;;  %s398_s4 = inlined_call_operand.vmem [shape: f32[1,10], index: 4, kind: input, shape index: {}]   ;;  %s399_s5 = inlined_call_operand.hbm [shape: f32[8,10], index: 5, kind: output, shape index: {}]  }
   0x1   :  { %v33_v0 = vld [vmem:[%s395_s1 + $0x58] sm:$0xff]  ;;  %238 = vmatprep.subr.mxu0 %v301_v1  ;;  %v32_v2 = vld [vmem:[%s395_s1 + $0x50] sm:$0xff]  ;;  %262 = vmatprep.mubr.msk.f32.mxu0 %vm302_vm0, %v301_v1  ;;  %v31_v3 = vld [vmem:[%s395_s1 + $0x48] sm:$0xff] }
   0x2   :  { %239 = vmatpush3.msra.mxu0 %v33_v0  ;;  %265 = vmatprep.subr.mxu1 %v301_v1  ;;  %v118_v4 = vld [vmem:[%s397_s3 + $0x18] sm:$0xff]  ;;  %v117_v5 = vld [vmem:[%s397_s3 + $0x10] sm:$0xff]  ;;  %v30_v6 = vld [vmem:[%s395_s1 + $0x40] sm:$0xff] }
   0x3   :  { %240 = vmatprep.subr.mxu0 %v301_v1  ;;  %273 = vmatprep.mubr.msk.f32.mxu1 %vm302_vm0, %v301_v1 }
   0x4   :  { %241 = vmatpush3.msra.mxu0 %v32_v2  ;;  %266 = vmatpush3.msra.mxu1 %v118_v4 }
   0x5   :  { %242 = vmatprep.subr.mxu0 %v301_v1 }
   0x6   :  { %10 = vsyncpa [#allocation3], 0  ;;  %243 = vmatpush3.msra.mxu0 %v31_v3  ;;  %267 = vmatprep.subr.mxu1 %v301_v1  ;;  %v29_v7 = vld [vmem:[%s395_s1 + $0x38] sm:$0xff]  ;;  %v28_v8 = vld [vmem:[%s395_s1 + $0x30] sm:$0xff]  ;;  %vm41_vm1 = vcmask 785408   ;;  %vm126_vm2 = vcmask 261120  }
   0x7   :  { %244 = vmatprep.subr.mxu0 %v301_v1  ;;  %268 = vmatpush3.msra.mxu1 %v117_v5  ;;  %v27_v9 = vld [vmem:[%s395_s1 + $0x28] sm:$0xff]  ;;  %v26_v10 = vld [vmem:[%s395_s1 + $0x20] sm:$0xff]  ;;  %v25_v11 = vld [vmem:[%s395_s1 + $0x18] sm:$0xff]  ;;  %s303_s29 = smov [#allocation2]   ;;  %vm200_vm3 = vcmask 80896  }
   0x8   :  { %245 = vmatpush3.msra.mxu0 %v30_v6  ;;  %269 = vmatprep.subr.mxu1 %v301_v1  ;;  %v24_v12 = vld [vmem:[%s395_s1 + $0x10] sm:$0xff]  ;;  %v23_v13 = vld [vmem:[%s395_s1 + $0x8] sm:$0xff]  ;;  %v22_v14 = vld [vmem:[%s395_s1] sm:$0xff]  ;;  %s208_s30 = sshll.u32 %s303_s29, 4  ;;  %s209_s30 = int_to_ptr.vmem [resolvable:$true] %s208_s30 }
   0x9   :  { %246 = vmatprep.subr.mxu0 %v301_v1  ;;  %v21_v15 = vld [vmem:[%s394_s0] sm:$0xff]  ;;  %v116_v16 = vld [vmem:[%s397_s3 + $0x8] sm:$0xff]  ;;  %p284_p1 = scmp.lt.s32.totalorder %s209_s30, %s209_s30 }
   0xa   :  { %247 = vmatpush3.msra.mxu0 %v29_v7  ;;  %270 = vmatpush3.msra.mxu1 %v116_v16  ;;  %v115_v17 = vld [vmem:[%s397_s3] sm:$0xff]  ;;  %s279_s3 = scalar_lea.vmem %s209_s30, 128 }
   0xb   :  { %248 = vmatprep.subr.mxu0 %v301_v1  ;;  %271 = vmatprep.subr.mxu1 %v301_v1  ;;  %v216_v18 = vld [vmem:[%s396_s2] ss:$0 sm:$0xff]  ;;  %p280_p0 = scmp.ne.s32.totalorder %s209_s30, %s279_s3  ;;  %p285_p2 = scmp.lt.s32.totalorder %s279_s3, %s279_s3 }
   0xc   :  { %249 = vmatpush3.msra.mxu0 %v28_v8  ;;  %272 = vmatpush3.msra.mxu1 %v115_v17  ;;  %v218_v22 = vld [vmem:[%s398_s4] ss:$0 sm:$0xff] }
   0xd   :  { %250 = vmatprep.subr.mxu0 %v301_v1  ;;  %p286_p3 = por %p285_p2, %p284_p1 }
   0xe   :  { %251 = vmatpush3.msra.mxu0 %v27_v9 }
   0xf   :  { %252 = vmatprep.subr.mxu0 %v301_v1  ;;  %p287_p4 = pnand %p286_p3, %p280_p0 }
  0x10   :  { %253 = vmatpush3.msra.mxu0 %v26_v10 }
  0x11   :  { %254 = vmatprep.subr.mxu0 %v301_v1 }
  0x12   :  { %255 = vmatpush3.msra.mxu0 %v25_v11 }
  0x13   :  { %256 = vmatprep.subr.mxu0 %v301_v1 }
  0x14   :  { %257 = vmatpush3.msra.mxu0 %v24_v12 }
  0x15   :  { %258 = vmatprep.subr.mxu0 %v301_v1 }
  0x16   :  { %259 = vmatpush3.msra.mxu0 %v23_v13 }
  0x17   :  { %260 = vmatprep.subr.mxu0 %v301_v1 }
  0x18   :  { %261 = vmatpush3.msra.mxu0 %v22_v14 }
  0x19   :  { %263 = vmatmul.mubr.msk.f32.vlgmr.msra.gmra.mxu0 %vm41_vm1, %v21_v15 }
  0xd9   :  { %v111_v19 = vpop.f32.mrf.mxu0 }
  0xda   :  { %v112_v20 = vadd.f32 %v216_v18, %v111_v19 }
  0xdb   :  { %v264_v21 = vpop.f32.mrf.mxu0 }
  0xdc   :  { %274 = vmatmul.mubr.msk.f32.vlgmr.msra.gmra.mxu1 %vm126_vm2, %v112_v20 }
 0x19c   :  { %v196_v23 = vpop.f32.mrf.mxu1 }
 0x19d   :  { %v197_v24 = vadd.f32 %v218_v22, %v196_v23 }
 0x19e   :  { %v275_v25 = vpop.f32.mrf.mxu1 }
 0x19f   :  { %201 = vst.msk [vmem:[#allocation2] sm:$0xff] %vm200_vm3, %v197_v24 }
 0x1a0   :  { %290 = shalt.err (!%p287_p4)
}
 0x1a1   :  { %211 = dma.vmem_to_hbm [thread:$0]  %s209_s30, 128, %s399_s5, [#allocation3]  }
 0x1a2   :  { %299 = dma.done.wait [#allocation3], 128  }
 0x1a3   :  { %300 = vsyncadd [#allocation3], 4294967168 }
 0x1a4   :  { %215 = vsyncpa [#allocation3], 1 }

</bundles_post_ra>
